<compile_context>
chip_gen: v7x
topology: tpu7x:2x2x1
jax: 0.10.0
libtpu: 0.0.40
codegen_flags: <defaults>
</compile_context>

<pallas_src>
import jax
import jax.numpy as jnp
from jax.experimental import pallas as pl
from jax.experimental.pallas import tpu as pltpu

IN_DIM = 300          # PepLand graph representation width
K_PAD = 384           # IN_DIM zero-padded to a multiple of 128
H0, H1 = 256, 128
OUT_DIM = 1


def _round_up(v, m):
    return ((v + m - 1) // m) * m


def mlp_head_kernel(x_ref, w0_ref, b0_ref, w1_ref, b1_ref, w2_ref, b2_ref, o_ref):
    # Layer 0: Linear(300->256) + ReLU   (K padded to 384 with zero rows in w0;
    # Dropout = identity at inference).  bf16 MXU matmul, f32 accumulate.
    h = jnp.dot(x_ref[...], w0_ref[...], preferred_element_type=jnp.float32)
    h = jnp.maximum(h + b0_ref[...], 0.0).astype(jnp.bfloat16)

    # Layer 1: Linear(256->128) + ReLU
    h = jnp.dot(h, w1_ref[...], preferred_element_type=jnp.float32)
    h = jnp.maximum(h + b1_ref[...], 0.0)                      # f32 (bm, H1)

    # Output: Linear(128->1) + Sigmoid, done as VPU multiply + cross-lane (XLU)
    # reduction (avoids an N=1 MXU matmul).  Result written lane-dense (1, bm).
    z = jnp.sum(h * w2_ref[...].astype(jnp.float32), axis=-1)  # (bm,)
    z = z[None, :] + b2_ref[...]                               # (1, bm)
    o_ref[...] = jax.nn.sigmoid(z)


def property_predictor_head(x, kparams, *, bm=256):
    """x: [B, 300] f32 graph representations. kparams: prepared (padded/bf16) params.
    Returns [B, 1] f32 sigmoid scores."""
    w0, b0, w1, b1, w2r, b2 = kparams
    B = x.shape[0]

    if B <= bm:
        # Small batch: one grid step, whole batch in a single block.
        bm = _round_up(max(B, 1), 8)
    else:
        # Multi-step grid: keep blocks (8,128)-aligned (lane-dense output blocks).
        bm = _round_up(bm, 128)
    B_pad = _round_up(B, bm)
    grid = (B_pad // bm,)

    # Host-side zero padding: batch -> B_pad, features 300 -> 384, cast to bf16.
    x_p = jnp.pad(x.astype(jnp.bfloat16), ((0, B_pad - B), (0, K_PAD - IN_DIM)))

    rep = lambda shape: pl.BlockSpec(shape, lambda i: (0,) * len(shape))  # resident

    out = pl.pallas_call(
        mlp_head_kernel,
        out_shape=jax.ShapeDtypeStruct((1, B_pad), jnp.float32),
        grid_spec=pltpu.PrefetchScalarGridSpec(
            num_scalar_prefetch=0,
            grid=grid,
            in_specs=[
                pl.BlockSpec((bm, K_PAD), lambda i: (i, 0)),   # x tile per step
                rep((K_PAD, H0)), rep((1, H0)),                # w0 (padded), b0
                rep((H0, H1)),    rep((1, H1)),                # w1, b1
                rep((1, H1)),     rep((1, 1)),                 # w2 row, b2
            ],
            out_specs=pl.BlockSpec((1, bm), lambda i: (0, i)),  # lane-dense row
        ),
        compiler_params=pltpu.CompilerParams(
            dimension_semantics=("parallel",)),
    )(x_p, w0, b0, w1, b1, w2r, b2)

    return out[0, :B][:, None]


def init_params(key):
    """Deterministic f32 parameters matching nn.Linear shapes (stored as [in, out])."""
    ks = jax.random.split(key, 6)

    def lin(kw, kb, fan_in, fan_out):
        bound = 1.0 / jnp.sqrt(fan_in)
        w = jax.random.uniform(kw, (fan_in, fan_out), jnp.float32, -bound, bound)
        b = jax.random.uniform(kb, (1, fan_out), jnp.float32, -bound, bound)
        return w, b

    w0, b0 = lin(ks[0], ks[1], IN_DIM, H0)
    w1, b1 = lin(ks[2], ks[3], H0, H1)
    w2, b2 = lin(ks[4], ks[5], H1, OUT_DIM)
    return (w0, b0, w1, b1, w2, b2)


def prepare_params(params):
    """Pad / transpose / cast parameters into kernel-ready layout."""
    w0, b0, w1, b1, w2, b2 = params
    w0p = jnp.pad(w0, ((0, K_PAD - IN_DIM), (0, 0))).astype(jnp.bfloat16)  # (384,256)
    w1p = w1.astype(jnp.bfloat16)                                          # (256,128)
    w2r = w2.T.astype(jnp.bfloat16)                                        # (1,128) row
    return (w0p, b0.astype(jnp.float32), w1p, b1.astype(jnp.float32),
            w2r, b2.astype(jnp.float32))


def reference(x, params):
    """Pure-JAX f32 reference of the MLP head (module semantics)."""
    w0, b0, w1, b1, w2, b2 = params
    h = jnp.maximum(x @ w0 + b0, 0.0)
    h = jnp.maximum(h @ w1 + b1, 0.0)
    return jax.nn.sigmoid(h @ w2 + b2)


if __name__ == "__main__":
    key = jax.random.PRNGKey(0)
    kx, kx2, kp = jax.random.split(key, 3)

    # TODO(synk): PepLandPredictor (pretrained DGL heterograph GNN) is not
    # translatable; the 300-dim graph representation is synthesized here.
    params = init_params(kp)
    kparams = prepare_params(params)

    # Small batch: single grid step (grid=(1,)), whole batch in one block.
    B = 8
    x = jax.random.normal(kx, (B, IN_DIM), dtype=jnp.float32)
    out = jax.block_until_ready(property_predictor_head(x, kparams))
    ref = reference(x, params)
    assert out.shape == (B, OUT_DIM)
    assert jnp.allclose(out, ref, atol=1e-2, rtol=1e-2), "mismatch vs reference (small B)"

    # Larger batch: exercises the bm=256 multi-step parallel grid and batch padding.
    B2 = 300
    x2 = jax.random.normal(kx2, (B2, IN_DIM), dtype=jnp.float32)
    out2 = jax.block_until_ready(property_predictor_head(x2, kparams))
    ref2 = reference(x2, params)
    assert out2.shape == (B2, OUT_DIM)
    assert jnp.allclose(out2, ref2, atol=1e-2, rtol=1e-2), "mismatch vs reference (large B)"

    print("KERNEL_OK")
</pallas_src>

<mosaic_0001>
module attributes {stable_mosaic.version = 11 : i64} {
  func.func @mlp_head_kernel(%arg0: i32, %arg1: memref<8x384xbf16, #tpu.memory_space<vmem>>, %arg2: memref<384x256xbf16, #tpu.memory_space<vmem>>, %arg3: memref<1x256xf32, #tpu.memory_space<vmem>>, %arg4: memref<256x128xbf16, #tpu.memory_space<vmem>>, %arg5: memref<1x128xf32, #tpu.memory_space<vmem>>, %arg6: memref<1x128xbf16, #tpu.memory_space<vmem>>, %arg7: memref<1x1xf32, #tpu.memory_space<vmem>>, %arg8: memref<1x8xf32, #tpu.memory_space<vmem>>) attributes {dimension_semantics = [#tpu.dimension_semantics<parallel>], iteration_bounds = array<i64: 1>, scalar_prefetch = 0 : i64, scratch_operands = 0 : i64, tpu.core_type = #tpu.core_type<tc>, window_params = [{transform_indices = @transform_0, window_bounds = array<i64: 8, 384>}, {pipeline_mode = #tpu.pipeline_mode<synchronous>, transform_indices = @transform_1, window_bounds = array<i64: 384, 256>}, {pipeline_mode = #tpu.pipeline_mode<synchronous>, transform_indices = @transform_2, window_bounds = array<i64: 1, 256>}, {pipeline_mode = #tpu.pipeline_mode<synchronous>, transform_indices = @transform_3, window_bounds = array<i64: 256, 128>}, {pipeline_mode = #tpu.pipeline_mode<synchronous>, transform_indices = @transform_4, window_bounds = array<i64: 1, 128>}, {pipeline_mode = #tpu.pipeline_mode<synchronous>, transform_indices = @transform_5, window_bounds = array<i64: 1, 128>}, {pipeline_mode = #tpu.pipeline_mode<synchronous>, transform_indices = @transform_6, window_bounds = array<i64: 1, 1>}, {transform_indices = @transform_7, window_bounds = array<i64: 1, 8>}]} {
    %c0 = arith.constant 0 : index
    %c0_0 = arith.constant 0 : index
    %0 = vector.load %arg1[%c0, %c0_0] : memref<8x384xbf16, #tpu.memory_space<vmem>>, vector<8x384xbf16>
    %c0_1 = arith.constant 0 : index
    %c0_2 = arith.constant 0 : index
    %1 = vector.load %arg2[%c0_1, %c0_2] : memref<384x256xbf16, #tpu.memory_space<vmem>>, vector<384x256xbf16>
    %cst = arith.constant dense<0.000000e+00> : vector<8x256xf32>
    %2 = tpu.matmul %0, %1, %cst {dimension_numbers = #tpu.dot_dimension_numbers<[1], [0], [0], [1], [0, 0, 1, 1], [], []>} : vector<8x384xbf16>, vector<384x256xbf16>, vector<8x256xf32> -> vector<8x256xf32>
    %c0_3 = arith.constant 0 : index
    %c0_4 = arith.constant 0 : index
    %3 = vector.load %arg3[%c0_3, %c0_4] : memref<1x256xf32, #tpu.memory_space<vmem>>, vector<1x256xf32>
    %4 = vector.broadcast %3 : vector<1x256xf32> to vector<8x256xf32>
    %5 = arith.addf %2, %4 : vector<8x256xf32>
    %cst_5 = arith.constant 0.000000e+00 : f32
    %6 = vector.broadcast %cst_5 : f32 to vector<8x256xf32>
    %7 = arith.maximumf %5, %6 : vector<8x256xf32>
    %8 = arith.truncf %7 : vector<8x256xf32> to vector<8x256xbf16>
    %c0_6 = arith.constant 0 : index
    %c0_7 = arith.constant 0 : index
    %9 = vector.load %arg4[%c0_6, %c0_7] : memref<256x128xbf16, #tpu.memory_space<vmem>>, vector<256x128xbf16>
    %cst_8 = arith.constant dense<0.000000e+00> : vector<8x128xf32>
    %10 = tpu.matmul %8, %9, %cst_8 {dimension_numbers = #tpu.dot_dimension_numbers<[1], [0], [0], [1], [0, 0, 1, 1], [], []>} : vector<8x256xbf16>, vector<256x128xbf16>, vector<8x128xf32> -> vector<8x128xf32>
    %c0_9 = arith.constant 0 : index
    %c0_10 = arith.constant 0 : index
    %11 = vector.load %arg5[%c0_9, %c0_10] : memref<1x128xf32, #tpu.memory_space<vmem>>, vector<1x128xf32>
    %12 = vector.broadcast %11 : vector<1x128xf32> to vector<8x128xf32>
    %13 = arith.addf %10, %12 : vector<8x128xf32>
    %cst_11 = arith.constant 0.000000e+00 : f32
    %14 = vector.broadcast %cst_11 : f32 to vector<8x128xf32>
    %15 = arith.maximumf %13, %14 : vector<8x128xf32>
    %c0_12 = arith.constant 0 : index
    %c0_13 = arith.constant 0 : index
    %16 = vector.load %arg6[%c0_12, %c0_13] : memref<1x128xbf16, #tpu.memory_space<vmem>>, vector<1x128xbf16>
    %17 = arith.extf %16 : vector<1x128xbf16> to vector<1x128xf32>
    %18 = vector.broadcast %17 : vector<1x128xf32> to vector<8x128xf32>
    %19 = arith.mulf %15, %18 : vector<8x128xf32>
    %cst_14 = arith.constant dense<0.000000e+00> : vector<8xf32>
    %20 = vector.multi_reduction <add>, %19, %cst_14 [1] : vector<8x128xf32> to vector<8xf32>
    %21 = vector.shape_cast %20 : vector<8xf32> to vector<1x8xf32>
    %c0_15 = arith.constant 0 : index
    %c0_16 = arith.constant 0 : index
    %22 = vector.load %arg7[%c0_15, %c0_16] : memref<1x1xf32, #tpu.memory_space<vmem>>, vector<1x1xf32>
    %23 = vector.broadcast %22 : vector<1x1xf32> to vector<1x8xf32>
    %24 = arith.addf %21, %23 : vector<1x8xf32>
    %25 = arith.negf %24 : vector<1x8xf32>
    %26 = math.exp %25 : vector<1x8xf32>
    %cst_17 = arith.constant 1.000000e+00 : f32
    %27 = vector.broadcast %cst_17 : f32 to vector<1x8xf32>
    %28 = arith.addf %27, %26 : vector<1x8xf32>
    %29 = arith.divf %27, %28 : vector<1x8xf32>
    %c0_18 = arith.constant 0 : index
    %c0_19 = arith.constant 0 : index
    %30 = vector.load %arg8[%c0_18, %c0_19] : memref<1x8xf32, #tpu.memory_space<vmem>>, vector<1x8xf32>
    tpu.vector_store %arg8[%c0_18, %c0_19], %29 {strides = array<i32>} : memref<1x8xf32, #tpu.memory_space<vmem>>, vector<1x8xf32>,
    return
  }
  func.func @transform_0(%arg0: i32) -> (i32, i32) {
    %c0_i32 = arith.constant 0 : i32
    %c0_i32_0 = arith.constant 0 : i32
    return %arg0, %c0_i32 : i32, i32
  }
  func.func @transform_1(%arg0: i32) -> (i32, i32) {
    %c0_i32 = arith.constant 0 : i32
    %c0_i32_0 = arith.constant 0 : i32
    %c0_i32_1 = arith.constant 0 : i32
    return %c0_i32, %c0_i32_0 : i32, i32
  }
  func.func @transform_2(%arg0: i32) -> (i32, i32) {
    %c0_i32 = arith.constant 0 : i32
    %c0_i32_0 = arith.constant 0 : i32
    %c0_i32_1 = arith.constant 0 : i32
    return %c0_i32, %c0_i32_0 : i32, i32
  }
  func.func @transform_3(%arg0: i32) -> (i32, i32) {
    %c0_i32 = arith.constant 0 : i32
    %c0_i32_0 = arith.constant 0 : i32
    %c0_i32_1 = arith.constant 0 : i32
    return %c0_i32, %c0_i32_0 : i32, i32
  }
  func.func @transform_4(%arg0: i32) -> (i32, i32) {
    %c0_i32 = arith.constant 0 : i32
    %c0_i32_0 = arith.constant 0 : i32
    %c0_i32_1 = arith.constant 0 : i32
    return %c0_i32, %c0_i32_0 : i32, i32
  }
  func.func @transform_5(%arg0: i32) -> (i32, i32) {
    %c0_i32 = arith.constant 0 : i32
    %c0_i32_0 = arith.constant 0 : i32
    %c0_i32_1 = arith.constant 0 : i32
    return %c0_i32, %c0_i32_0 : i32, i32
  }
  func.func @transform_6(%arg0: i32) -> (i32, i32) {
    %c0_i32 = arith.constant 0 : i32
    %c0_i32_0 = arith.constant 0 : i32
    %c0_i32_1 = arith.constant 0 : i32
    return %c0_i32, %c0_i32_0 : i32, i32
  }
  func.func @transform_7(%arg0: i32) -> (i32, i32) {
    %c0_i32 = arith.constant 0 : i32
    %c0_i32_0 = arith.constant 0 : i32
    return %c0_i32, %arg0 : i32, i32
  }
}

</mosaic_0001>

<bundles_post_ra>
// kernel: tpu_custom_call.1
= control target key start
LH: loop header
LB: loop body
LE: loop exit
PB: predicated region body
PF: predicated region fallthrough
CT: control target
= control target key end

     0   :  { %s1099_s0 = inlined_call_operand.hbm [shape: bf16[8,384], index: 0, kind: input, shape index: {}]   ;;  %s1100_s1 = inlined_call_operand.hbm [shape: bf16[384,256], index: 1, kind: input, shape index: {}]   ;;  %s1101_s2 = inlined_call_operand.vmem [shape: f32[1,256], index: 2, kind: input, shape index: {}]   ;;  %s1102_s3 = inlined_call_operand.hbm [shape: bf16[256,128], index: 3, kind: input, shape index: {}]   ;;  %s1103_s4 = inlined_call_operand.vmem [shape: f32[1,128], index: 4, kind: input, shape index: {}]   ;;  %s1104_s5 = inlined_call_operand.vmem [shape: bf16[1,128], index: 5, kind: input, shape index: {}]   ;;  %s1105_s6 = inlined_call_operand.<no memory space> [shape: f32[1,1], index: 6, kind: input, shape index: {}]   ;;  %s1106_s7 = inlined_call_operand.hbm [shape: f32[1,8], index: 7, kind: output, shape index: {}]  }
   0x1   :  { %v12_v0 = vstv %s1105_s6 }
   0x2   :  { %13 = vst [vmem:[#allocation2] sm:$0x1] %v12_v0 }
   0x3   :  { %14 = vsyncpa [#allocation4], 0 }
   0x4   :  { %15 = vsyncpa [#allocation7], 0 }
   0x5   :  { %16 = vsyncpa [#allocation5], 0  ;;  %s990_s26 = smov [#allocation6]   ;;  %s896_s30 = scalar_lea.hbm %s1100_s1, 6144 }
   0x6   :  { %s32_s27 = sshll.u32 %s990_s26, 4  ;;  %p897_p0 = scmp.ne.s32.totalorder %s1100_s1, %s896_s30  ;;  %s33_s27 = int_to_ptr.vmem [resolvable:$true] %s32_s27 }
   0x7   :  { %p900_p1 = scmp.lt.u32.totalorder %s896_s30, %s1100_s1 }
   0x9   :  { %p902_p2 = pnand %p900_p1, %p897_p0 }
   0xb   :  { %905 = shalt.err (!%p902_p2)
}
   0xc   :  { %s906_s6 = scalar_lea.vmem %s33_s27, 6144  ;;  %p911_p4 = scmp.lt.s32.totalorder %s33_s27, %s33_s27 }
   0xd   :  { %p907_p3 = scmp.ne.s32.totalorder %s33_s27, %s906_s6  ;;  %p912_p5 = scmp.lt.s32.totalorder %s906_s6, %s906_s6 }
   0xf   :  { %p913_p6 = por %p912_p5, %p911_p4 }
  0x11   :  { %p914_p7 = pnand %p913_p6, %p907_p3 }
  0x13   :  { %917 = shalt.err (!%p914_p7)
}
  0x14   :  { %s991_s12 = smov 128   ;;  %s992_s13 = smov 8  }
  0x15   :  { %38 = dma.hbm_to_vmem [thread:$0]  %s1100_s1, 6144, %s33_s27, [#allocation7], %s991_s12, %s991_s12, %s992_s13  }
  0x16   :  { %s993_s16 = smov [#allocation3]   ;;  %s994_s18 = smov [#allocation8]  }
  0x17   :  { %s23_s17 = sshll.u32 %s993_s16, 4  ;;  %s46_s19 = sshll.u32 %s994_s18, 4  ;;  %s24_s17 = int_to_ptr.vmem [resolvable:$true] %s23_s17  ;;  %s47_s19 = int_to_ptr.vmem [resolvable:$true] %s46_s19 }
  0x18   :  { %s918_s22 = scalar_lea.hbm %s1099_s0, 192 }
  0x19   :  { %p919_p8 = scmp.ne.s32.totalorder %s1099_s0, %s918_s22  ;;  %p922_p9 = scmp.lt.u32.totalorder %s918_s22, %s1099_s0 }
  0x1b   :  { %p924_p10 = pnand %p922_p9, %p919_p8 }
  0x1d   :  { %927 = shalt.err (!%p924_p10)
}
  0x1e   :  { %s928_s1 = scalar_lea.vmem %s24_s17, 192  ;;  %p933_p12 = scmp.lt.s32.totalorder %s24_s17, %s24_s17 }
  0x1f   :  { %p929_p11 = scmp.ne.s32.totalorder %s24_s17, %s928_s1  ;;  %p934_p13 = scmp.lt.s32.totalorder %s928_s1, %s928_s1 }
  0x21   :  { %p935_p0 = por %p934_p13, %p933_p12 }
  0x23   :  { %p936_p1 = pnand %p935_p0, %p929_p11 }
  0x25   :  { %939 = shalt.err (!%p936_p1)
}
  0x26   :  { %26 = dma.hbm_to_vmem [thread:$0]  %s1099_s0, 192, %s24_s17, [#allocation4]  }
  0x27   :  { %s940_s8 = scalar_lea.hbm %s1102_s3, 2048 }
  0x28   :  { %p941_p2 = scmp.ne.s32.totalorder %s1102_s3, %s940_s8  ;;  %p944_p3 = scmp.lt.u32.totalorder %s940_s8, %s1102_s3 }
  0x2a   :  { %p946_p4 = pnand %p944_p3, %p941_p2 }
  0x2c   :  { %949 = shalt.err (!%p946_p4)
}
  0x2d   :  { %s950_s12 = scalar_lea.vmem %s47_s19, 2048  ;;  %p955_p6 = scmp.lt.s32.totalorder %s47_s19, %s47_s19 }
  0x2e   :  { %p951_p5 = scmp.ne.s32.totalorder %s47_s19, %s950_s12  ;;  %p956_p7 = scmp.lt.s32.totalorder %s950_s12, %s950_s12 }
  0x30   :  { %p957_p8 = por %p956_p7, %p955_p6 }
  0x32   :  { %p958_p9 = pnand %p957_p8, %p951_p5 }
  0x34   :  { %961 = shalt.err (!%p958_p9)
}
  0x35   :  { %s995_s0 = smov 64   ;;  %s996_s13 = smov 4  }
  0x36   :  { %52 = dma.hbm_to_vmem [thread:$0]  %s1102_s3, 2048, %s47_s19, [#allocation7], %s995_s0, %s995_s0, %s996_s13  }
  0x37   :  { %984 = dma.done.wait [#allocation4], 192  }
  0x38   :  { %985 = vsyncadd [#allocation4], 4294967104 }
  0x39   :  { %986 = dma.done.wait [#allocation7], 8192  }
  0x3a   :  { %987 = vsyncadd [#allocation7], 4294959104  ;;  %v997_v1 = vmov 0   ;;  %v801_v2 = vld [vmem:[#allocation6 + $0x4] ss:$8 sps:$4 sm:$0xff]   ;;  %v69_v34 = vld [vmem:[#allocation3] sm:$0xff] }
  0x3b   :  { %455 = vmatprep.mubr.bf16.mxu1 %v997_v1  ;;  %800 = vset.pattern.permute.xlu0 %v997_v1  ;;  %v803_v3 = vld [vmem:[#allocation6] ss:$8 sps:$4 sm:$0xff]   ;;  %v804_v4 = vld [vmem:[#allocation6 + $0x14] ss:$8 sps:$4 sm:$0xff]   ;;  %v806_v5 = vld [vmem:[#allocation6 + $0x10] ss:$8 sps:$4 sm:$0xff]   ;;  %v697_v36 = vcombine.high %v69_v34, %v69_v34  ;;  %v696_v63 = vcombine.low %v69_v34, %v69_v34 }
  0x3c   :  { %382 = vmatprep.subr.bf16.mxu0 %v801_v2  ;;  %v807_v6 = vld [vmem:[#allocation6 + $0x24] ss:$8 sps:$4 sm:$0xff]   ;;  %v809_v7 = vld [vmem:[#allocation6 + $0x20] ss:$8 sps:$4 sm:$0xff]   ;;  %v810_v8 = vld [vmem:[#allocation6 + $0x34] ss:$8 sps:$4 sm:$0xff]  }
  0x3d   :  { %383 = vmatpush1.bf16.msra.mxu0 %v803_v3  ;;  %v812_v9 = vld [vmem:[#allocation6 + $0x30] ss:$8 sps:$4 sm:$0xff]   ;;  %v825_v10 = vld [vmem:[#allocation6 + $0x104] ss:$8 sps:$4 sm:$0xff]   ;;  %v829_v12 = vld [vmem:[#allocation6 + $0x100] ss:$8 sps:$4 sm:$0xff]   ;;  %414 = vmatprep.mubr.bf16.mxu0 %v697_v36 }
  0x3e   :  { %384 = vmatprep.subr.bf16.mxu0 %v804_v4  ;;  %v813_v11 = vld [vmem:[#allocation6 + $0x44] ss:$8 sps:$4 sm:$0xff]   ;;  %423 = vmatprep.subr.bf16.mxu1 %v825_v10  ;;  %v831_v13 = vld [vmem:[#allocation6 + $0x114] ss:$8 sps:$4 sm:$0xff]   ;;  %v815_v14 = vld [vmem:[#allocation6 + $0x40] ss:$8 sps:$4 sm:$0xff]   ;;  %v121_v10 = vlaneseq }
  0x3f   :  { %424 = vmatpush1.bf16.msra.mxu1 %v829_v12  ;;  %v816_v15 = vld [vmem:[#allocation6 + $0x54] ss:$8 sps:$4 sm:$0xff]   ;;  %v835_v16 = vld [vmem:[#allocation6 + $0x110] ss:$8 sps:$4 sm:$0xff]   ;;  %v837_v17 = vld [vmem:[#allocation6 + $0x124] ss:$8 sps:$4 sm:$0xff]  }
  0x40   :  { %425 = vmatprep.subr.bf16.mxu1 %v831_v13  ;;  %v818_v18 = vld [vmem:[#allocation6 + $0x50] ss:$8 sps:$4 sm:$0xff]   ;;  %v841_v19 = vld [vmem:[#allocation6 + $0x120] ss:$8 sps:$4 sm:$0xff]   ;;  %v843_v20 = vld [vmem:[#allocation6 + $0x134] ss:$8 sps:$4 sm:$0xff]  }
  0x41   :  { %385 = vmatpush1.bf16.msra.mxu0 %v806_v5  ;;  %v819_v21 = vld [vmem:[#allocation6 + $0x64] ss:$8 sps:$4 sm:$0xff]   ;;  %v847_v22 = vld [vmem:[#allocation6 + $0x130] ss:$8 sps:$4 sm:$0xff]   ;;  %v821_v23 = vld [vmem:[#allocation6 + $0x60] ss:$8 sps:$4 sm:$0xff]  }
  0x42   :  { %386 = vmatprep.subr.bf16.mxu0 %v807_v6  ;;  %v849_v24 = vld [vmem:[#allocation6 + $0x144] ss:$8 sps:$4 sm:$0xff]   ;;  %v822_v25 = vld [vmem:[#allocation6 + $0x74] ss:$8 sps:$4 sm:$0xff]   ;;  %v824_v26 = vld [vmem:[#allocation6 + $0x70] ss:$8 sps:$4 sm:$0xff]  }
  0x43   :  { %426 = vmatpush1.bf16.msra.mxu1 %v835_v16  ;;  %v853_v27 = vld [vmem:[#allocation6 + $0x140] ss:$8 sps:$4 sm:$0xff]   ;;  %v855_v28 = vld [vmem:[#allocation6 + $0x154] ss:$8 sps:$4 sm:$0xff]   ;;  %v827_v29 = vld [vmem:[#allocation6 + $0x84] ss:$8 sps:$4 sm:$0xff]  }
  0x44   :  { %427 = vmatprep.subr.bf16.mxu1 %v837_v17  ;;  %v859_v30 = vld [vmem:[#allocation6 + $0x150] ss:$8 sps:$4 sm:$0xff]   ;;  %v830_v31 = vld [vmem:[#allocation6 + $0x80] ss:$8 sps:$4 sm:$0xff]   ;;  %v861_v32 = vld [vmem:[#allocation6 + $0x164] ss:$8 sps:$4 sm:$0xff]  }
  0x45   :  { %387 = vmatpush1.bf16.msra.mxu0 %v809_v7  ;;  %v833_v33 = vld [vmem:[#allocation6 + $0x94] ss:$8 sps:$4 sm:$0xff]   ;;  %v836_v35 = vld [vmem:[#allocation6 + $0x90] ss:$8 sps:$4 sm:$0xff]   ;;  %v865_v37 = vld [vmem:[#allocation6 + $0x160] ss:$8 sps:$4 sm:$0xff]  }
  0x46   :  { %388 = vmatprep.subr.bf16.mxu0 %v810_v8  ;;  %v867_v38 = vld [vmem:[#allocation6 + $0x174] ss:$8 sps:$4 sm:$0xff]   ;;  %v839_v39 = vld [vmem:[#allocation6 + $0xa4] ss:$8 sps:$4 sm:$0xff]   ;;  %v842_v40 = vld [vmem:[#allocation6 + $0xa0] ss:$8 sps:$4 sm:$0xff]  }
  0x47   :  { %428 = vmatpush1.bf16.msra.mxu1 %v841_v19  ;;  %v845_v41 = vld [vmem:[#allocation6 + $0xb4] ss:$8 sps:$4 sm:$0xff]   ;;  %v871_v42 = vld [vmem:[#allocation6 + $0x170] ss:$8 sps:$4 sm:$0xff]   ;;  %v876_v43 = vld [vmem:[#allocation8 + $0x40] sm:$0xff]   ;;  %vm678_vm0 = vcmask 57344  }
  0x48   :  { %429 = vmatprep.subr.bf16.mxu1 %v843_v20  ;;  %v875_v44 = vld [vmem:[#allocation3 + $0x8] ss:$0 sps:$4 sm:$0xff]   ;;  %v848_v45 = vld [vmem:[#allocation6 + $0xb0] ss:$8 sps:$4 sm:$0xff]   ;;  %v877_v46 = vld [vmem:[#allocation8] sm:$0xff]  }
  0x49   :  { %389 = vmatpush1.bf16.msra.mxu0 %v812_v9  ;;  %v851_v47 = vld [vmem:[#allocation6 + $0xc4] ss:$8 sps:$4 sm:$0xff]   ;;  %v854_v50 = vld [vmem:[#allocation6 + $0xc0] ss:$8 sps:$4 sm:$0xff]   ;;  %v880_v51 = vld [vmem:[#allocation8 + $0x50] sm:$0xff]  }
  0x4a   :  { %390 = vmatprep.subr.bf16.mxu0 %v813_v11  ;;  %v878_v48 = vld [vmem:[#allocation8 + $0x48] sm:$0xff]   ;;  %v857_v52 = vld [vmem:[#allocation6 + $0xd4] ss:$8 sps:$4 sm:$0xff]   ;;  %v860_v54 = vld [vmem:[#allocation6 + $0xd0] ss:$8 sps:$4 sm:$0xff]   ;;  %v122_v11 = vshrl.u32 %v121_v10, 7 }
  0x4b   :  { %430 = vmatpush1.bf16.msra.mxu1 %v847_v22  ;;  %v879_v49 = vld [vmem:[#allocation8 + $0x8] sm:$0xff]   ;;  %v881_v53 = vld [vmem:[#allocation8 + $0x10] sm:$0xff]   ;;  %v882_v55 = vld [vmem:[#allocation8 + $0x58] sm:$0xff]  }
  0x4c   :  { %431 = vmatprep.subr.bf16.mxu1 %v849_v24  ;;  %v863_v56 = vld [vmem:[#allocation6 + $0xe4] ss:$8 sps:$4 sm:$0xff]   ;;  %v883_v57 = vld [vmem:[#allocation8 + $0x18] sm:$0xff]   ;;  %v866_v58 = vld [vmem:[#allocation6 + $0xe0] ss:$8 sps:$4 sm:$0xff]   ;;  %v123_v12 = vsub.s32 0, %v122_v11 }
  0x4d   :  { %391 = vmatpush1.bf16.msra.mxu0 %v815_v14  ;;  %v884_v59 = vld [vmem:[#allocation8 + $0x60] sm:$0xff]   ;;  %v869_v60 = vld [vmem:[#allocation6 + $0xf4] ss:$8 sps:$4 sm:$0xff]   ;;  %v872_v62 = vld [vmem:[#allocation6 + $0xf0] ss:$8 sps:$4 sm:$0xff]   ;;  %v127_v14 = vsub.s32 1, %v122_v11 }
  0x4e   :  { %392 = vmatprep.subr.bf16.mxu0 %v816_v15  ;;  %v885_v61 = vld [vmem:[#allocation8 + $0x20] sm:$0xff]   ;;  %v886_v0 = vld [vmem:[#allocation8 + $0x68] sm:$0xff]   ;;  %v888_v2 = vld [vmem:[#allocation8 + $0x70] sm:$0xff]  }
  0x4f   :  { %432 = vmatpush1.bf16.msra.mxu1 %v853_v27  ;;  %v887_v1 = vld [vmem:[#allocation8 + $0x28] sm:$0xff]   ;;  %v889_v3 = vld [vmem:[#allocation8 + $0x30] sm:$0xff]   ;;  %v890_v4 = vld [vmem:[#allocation8 + $0x78] sm:$0xff]  }
  0x50   :  { %433 = vmatprep.subr.bf16.mxu1 %v855_v28  ;;  %v891_v5 = vld [vmem:[#allocation8 + $0x38] sm:$0xff]   ;;  %v119_v13 = vld [vmem:[%s1101_s2] sm:$0x3] }
  0x51   :  { %393 = vmatpush1.bf16.msra.mxu0 %v818_v18  ;;  %v124_v15 = vrot.slane %v119_v13, %v123_v12  ;;  %v128_v16 = vrot.slane %v119_v13, %v127_v14 }
  0x52   :  { %394 = vmatprep.subr.bf16.mxu0 %v819_v21 }
  0x53   :  { %434 = vmatpush1.bf16.msra.mxu1 %v859_v30 }
  0x54   :  { %435 = vmatprep.subr.bf16.mxu1 %v861_v32 }
  0x55   :  { %395 = vmatpush1.bf16.msra.mxu0 %v821_v23 }
  0x56   :  { %396 = vmatprep.subr.bf16.mxu0 %v822_v25 }
  0x57   :  { %436 = vmatpush1.bf16.msra.mxu1 %v865_v37 }
  0x58   :  { %437 = vmatprep.subr.bf16.mxu1 %v867_v38 }
  0x59   :  { %397 = vmatpush1.bf16.msra.mxu0 %v824_v26 }
  0x5a   :  { %398 = vmatprep.subr.bf16.mxu0 %v827_v29  ;;  %v644_v29 = vld [vmem:[%s1104_s5] sm:$0x1] }
  0x5b   :  { %438 = vmatpush1.bf16.msra.mxu1 %v871_v42 }
  0x5c   :  { %765 = vmatprep.subr.bf16.mxu1 %v876_v43 }
  0x5d   :  { %399 = vmatpush1.bf16.msra.mxu0 %v830_v31  ;;  %v645_v31 = vunpack.c.l.bf16 %v644_v29 }
  0x5e   :  { %400 = vmatprep.subr.bf16.mxu0 %v833_v33  ;;  %456 = vmatmul.mubr.bf16.vlgmr.msra.gmra.mrb[0].mxu1 %v875_v44  ;;  %v747_v33 = vld [vmem:[%s1103_s4] ss:$0 sm:$0xff]  ;;  %s998_s4 = smov [#allocation9]  }
  0x5f   :  { %766 = vmatpush3.bf16.msra.mxu1 %v877_v46  ;;  %v649_v38 = vrot.slane %v645_v31, %v123_v12  ;;  %s686_s5 = sshll.u32 %s998_s4, 4  ;;  %s687_s5 = int_to_ptr.vmem [resolvable:$true] %s686_s5 }
  0x60   :  { %767 = vmatprep.subr.bf16.mxu1 %v878_v48  ;;  %s962_s20 = scalar_lea.vmem %s687_s5, 16  ;;  %s966_s21 = scalar_lea.vmem %s687_s5, 32 }
  0x61   :  { %401 = vmatpush1.bf16.msra.mxu0 %v836_v35  ;;  %p963_p10 = scmp.ne.s32.totalorder %s687_s5, %s962_s20  ;;  %p967_p11 = scmp.lt.s32.totalorder %s687_s5, %s687_s5 }
  0x62   :  { %402 = vmatprep.subr.bf16.mxu0 %v839_v39  ;;  %p968_p12 = scmp.lt.s32.totalorder %s966_s21, %s962_s20 }
  0x63   :  { %768 = vmatpush3.bf16.msra.mxu1 %v879_v49  ;;  %v672_v49 = vand.u32 127, %v121_v10 }
  0x64   :  { %769 = vmatprep.subr.bf16.mxu1 %v880_v51  ;;  %p969_p13 = por %p968_p12, %p967_p11 }
  0x65   :  { %403 = vmatpush1.bf16.msra.mxu0 %v842_v40 }
  0x66   :  { %404 = vmatprep.subr.bf16.mxu0 %v845_v41  ;;  %v653_v41 = vld [vmem:[#allocation2] sm:$0x1]  ;;  %p970_p0 = pnand %p969_p13, %p963_p10 }
  0x67   :  { %770 = vmatpush3.bf16.msra.mxu1 %v881_v53 }
  0x68   :  { %771 = vmatprep.subr.bf16.mxu1 %v882_v55 }
  0x69   :  { %405 = vmatpush1.bf16.msra.mxu0 %v848_v45 }
  0x6a   :  { %406 = vmatprep.subr.bf16.mxu0 %v851_v47 }
  0x6b   :  { %772 = vmatpush3.bf16.msra.mxu1 %v883_v57 }
  0x6c   :  { %773 = vmatprep.subr.bf16.mxu1 %v884_v59 }
  0x6d   :  { %407 = vmatpush1.bf16.msra.mxu0 %v854_v50  ;;  %v675_v50 = vsub.s32 %v672_v49, %v122_v11 }
  0x6e   :  { %408 = vmatprep.subr.bf16.mxu0 %v857_v52 }
  0x6f   :  { %774 = vmatpush3.bf16.msra.mxu1 %v885_v61 }
  0x70   :  { %775 = vmatprep.subr.bf16.mxu1 %v886_v0 }
  0x71   :  { %409 = vmatpush1.bf16.msra.mxu0 %v860_v54 }
  0x72   :  { %410 = vmatprep.subr.bf16.mxu0 %v863_v56 }
  0x73   :  { %776 = vmatpush3.bf16.msra.mxu1 %v887_v1 }
  0x74   :  { %777 = vmatprep.subr.bf16.mxu1 %v888_v2 }
  0x75   :  { %411 = vmatpush1.bf16.msra.mxu0 %v866_v58 }
  0x76   :  { %412 = vmatprep.subr.bf16.mxu0 %v869_v60 }
  0x77   :  { %778 = vmatpush3.bf16.msra.mxu1 %v889_v3 }
  0x78   :  { %779 = vmatprep.subr.bf16.mxu1 %v890_v4 }
  0x79   :  { %413 = vmatpush1.bf16.msra.mxu0 %v872_v62 }
  0x7b   :  { %780 = vmatpush3.bf16.msra.mxu1 %v891_v5 }
  0x7c   :  { %415 = vmatmul.mubr.bf16.vlgmr.msra.gmra.mrb[0].mxu0 %v696_v63 }
 0x131   :  { %v457_v6 = vpop.f32.mrb[0].mxu1 }
 0x132   :  { %v459_v7 = vpop.f32.mrb[1].mxu1 }
 0x133   :  { %v461_v8 = vpop.f32.mrb[2].mxu1 }
 0x134   :  { %v462_v9 = vpop.f32.mrb[3].mxu1 }
 0x14f   :  { %v416_v17 = vpop.f32.mrb[0].mxu0 }
 0x150   :  { %v417_v18 = vadd.f32 %v416_v17, %v124_v15  ;;  %v418_v19 = vpop.f32.mrb[1].mxu0 }
 0x151   :  { %v419_v20 = vadd.f32 %v418_v19, %v128_v16  ;;  %v420_v21 = vpop.f32.mrb[2].mxu0 }
 0x152   :  { %v458_v22 = vadd.f32 %v457_v6, %v417_v18  ;;  %v421_v23 = vpop.f32.mrb[3].mxu0 }
 0x153   :  { %v460_v24 = vadd.f32 %v459_v7, %v419_v20 }
 0x154   :  { %v464_v25 = vmax.f32 %v458_v22, 0.0 }
 0x155   :  { %v465_v26 = vmax.f32 %v460_v24, 0.0 }
 0x156   :  { %v466_v28 = vpack.c.bf16 %v464_v25, %v464_v25 }
 0x157   :  { %v467_v27 = vpack.c.bf16 %v465_v26, %v465_v26 }
 0x159   :  { %635 = vmatprep.mubr.bf16.mxu1 %v467_v27 }
 0x15a   :  { %636 = vmatmul.mubr.bf16.vlgmr.msra.gmra.mrb[4].mxu1 %v466_v28 }
 0x22d   :  { %v781_v30 = vpop.f32.mrb[4].mxu1 }
 0x22e   :  { %v782_v32 = vpop.f32.mrb[5].mxu1 }
 0x22f   :  { %v783_v34 = vadd.f32 %v782_v32, %v781_v30  ;;  %v784_v35 = vpop.f32.mrb[6].mxu1 }
 0x230   :  { %v785_v36 = vpop.f32.mrb[7].mxu1 }
 0x231   :  { %v638_v37 = vadd.f32 %v783_v34, %v747_v33 }
 0x233   :  { %v643_v39 = vmax.f32 %v638_v37, 0.0 }
 0x235   :  { %v650_v40 = vmul.f32 %v649_v38, %v643_v39 }
 0x237   :  { %651 = vadd.xlane.f32.xlu0 %v650_v40 }
 0x24d   :  { %656 = vperm.xlu0 %800, %v653_v41  }
 0x2c4   :  { %v652_v42 = vpop.xlane.xlu0 %651 }
 0x2cc   :  { %v657_v43 = vpop.permute.xlu0 %656 }
 0x2cd   :  { %v662_v44 = vrot.slane %v657_v43, %v123_v12 }
 0x2cf   :  { %v663_v45 = vadd.f32 %v662_v44, %v652_v42 }
 0x2d1   :  { %v764_v46 = vmul.f32 -1.442695, %v663_v45 }
 0x2d3   :  { %892 = vpow2.f32 %v764_v46 }
 0x2dd   :  { %v893_v47 = vpop.eup %892 }
 0x2de   :  { %v667_v48 = vadd.f32 1.0, %v893_v47 }
 0x2e0   :  { %894 = vrcp.f32 %v667_v48 }
 0x2ea   :  { %v895_v51 = vpop.eup %894 }
 0x2eb   :  { %v676_v52 = vrot.slane %v895_v51, %v675_v50 }
 0x2ed   :  { %679 = vst.msk [vmem:[#allocation9] sm:$0x1] %vm678_vm0, %v676_v52 }
 0x2ee   :  { %973 = shalt.err (!%p970_p0)
}
 0x2ef   :  { %s974_s24 = scalar_lea.hbm %s1106_s7, 16 }
 0x2f0   :  { %p975_p1 = scmp.ne.s32.totalorder %s1106_s7, %s974_s24  ;;  %p978_p2 = scmp.lt.u32.totalorder %s974_s24, %s1106_s7 }
 0x2f2   :  { %p980_p3 = pnand %p978_p2, %p975_p1 }
 0x2f4   :  { %983 = shalt.err (!%p980_p3)
}
 0x2f5   :  { %689 = dma.vmem_to_hbm [thread:$0]  %s687_s5, 16, %s1106_s7, [#allocation5]  }
 0x2f6   :  { %988 = dma.done.wait [#allocation5], 16  }
 0x2f7   :  { %989 = vsyncadd [#allocation5], 4294967280 }
 0x2f8   :  { %693 = vsyncpa [#allocation4], 1 }
 0x2f9   :  { %694 = vsyncpa [#allocation7], 1 }
 0x2fa   :  { %695 = vsyncpa [#allocation5], 1 }

</bundles_post_ra>
